<compile_context>
chip_gen: v7x
topology: tpu7x:2x2x1
jax: 0.10.0
libtpu: 0.0.40
codegen_flags: <defaults>
</compile_context>

<pallas_src>
import functools

import jax
import jax.numpy as jnp
from jax.experimental import pallas as pl
from jax.experimental.pallas import tpu as pltpu


def _round_up(x, m):
    return (x + m - 1) // m * m


def _round_down(x, m):
    return x // m * m


def _mlp_kernel(xT_ref, w1_ref, b1_ref, w2_ref, b2_ref, w3_ref, b3_ref, o_ref,
                *, bf16_matmul):
    # Transposed compute: batch lives on the lane axis, so every intermediate
    # and the output store are lane-dense.
    #   xT: (3, TILE_N)   w1: (M, 3)  b1: (M, 1)
    #   w2: (M, M)        b2: (M, 1)
    #   w3: (1, M)        b3: (1, 1) scalar in SMEM
    #   o : (1, TILE_N)

    def sigmoid(z):
        # EUP-friendly sigmoid: one tanh (EUP slot) + two cheap VALU ops,
        # instead of exp + full-precision f32 divide (several VALU ops/elem).
        return 0.5 * jnp.tanh(0.5 * z) + 0.5

    # Layer 1 on the MXU.  K=3 is heavily padded, but the MXU is nearly idle
    # here and this removes ~6 VALU ops/element from the binding VALU slot.
    z1 = jnp.dot(w1_ref[...], xT_ref[...],
                 preferred_element_type=jnp.float32) + b1_ref[...]
    h1 = sigmoid(z1)                                    # (M, TILE_N)

    # Layer 2: the real matmul.  Optionally bf16 inputs (f32 accumulation) for
    # large M, where the f32 MXU path on v5e/v6e is multi-pass.
    h1_in = h1.astype(jnp.bfloat16) if bf16_matmul else h1
    z2 = jnp.dot(w2_ref[...], h1_in,
                 preferred_element_type=jnp.float32) + b2_ref[...]
    h2 = sigmoid(z2)                                    # (M, TILE_N)

    # Layer 3 as a (1, M) @ (M, TILE_N) MXU matvec; scalar bias from SMEM.
    z3 = jnp.dot(w3_ref[...], h2,
                 preferred_element_type=jnp.float32) + b3_ref[0, 0]
    o_ref[...] = sigmoid(z3)                            # (1, TILE_N) lane-dense


def mymodel_forward(x, params, *, max_tile_n=32768, bf16_matmul=None):
    """x: (N, 3) float32 -> (N, 1) float32.

    Params use PyTorch-native layouts: w1 (M,3), b1 (M,1), w2 (M,M), b2 (M,1),
    w3 (1,M), b3 (1,1).
    """
    n = x.shape[0]
    m = params["w1"].shape[0]
    if bf16_matmul is None:
        bf16_matmul = m >= 256

    w2 = params["w2"].astype(jnp.bfloat16) if bf16_matmul else params["w2"]
    w2_bytes = w2.size * w2.dtype.itemsize
    small_bytes = 4 * (3 * m + m + m + m + 1)          # w1,b1,b2,w3,b3

    # ---- VMEM budget (safe on v5e/v6e 128 MiB and v7x 64 MiB physical) ----
    # Per batch column (f32): ~6 live (M,) temporaries (z1/h1/z2/h2 + margin)
    # + double-buffered x tile (3 -> 8 sublanes) + double-buffered out tile.
    per_col_bytes = 4 * (6 * m + 2 * 8 + 2 * 8)
    # Count weights as double-buffered (pipeline default), so large-M configs
    # don't silently spill on v7x.
    weight_bytes = 2 * (w2_bytes + small_bytes)
    budget_bytes = 24 * 1024 * 1024

    if n <= 128:
        # Single full-extent block: always a legal BlockSpec, no raggedness.
        tile_n = n
    else:
        tile_cap = max(128, _round_down(
            max(budget_bytes - weight_bytes, 128 * per_col_bytes) // per_col_bytes,
            128))
        # Keep >= 2 grid steps when the batch allows it so v7x's second
        # TensorCore gets work under dimension_semantics=("parallel",).
        two_core_cap = max(128, _round_down(n // 2, 128))
        tile_n = max(128, min(max_tile_n, tile_cap, two_core_cap))

    grid = (pl.cdiv(n, tile_n),)

    # No wrapper-side batch padding: Pallas handles the ragged last block
    # (overhang loads are don't-care through elementwise math; overhang stores
    # are discarded).
    xT = x.T                                            # (3, N), lane-dense in-kernel
    # TODO(synk): accept x pre-transposed as (3, N) to drop this extra HBM
    # read+write of x (the kernel itself only needs ~16 B/sample).

    vmem_need = weight_bytes + tile_n * per_col_bytes + (4 << 20)
    vmem_limit = int(min(max(32 * 1024 * 1024, vmem_need), 112 * 1024 * 1024))

    cost = pl.CostEstimate(
        flops=2 * n * (3 * m + m * m + m),
        transcendentals=n * (2 * m + 1),
        bytes_accessed=4 * (3 * n + n) + w2_bytes + small_bytes,
    )

    kernel = functools.partial(_mlp_kernel, bf16_matmul=bf16_matmul)

    out = pl.pallas_call(
        kernel,
        out_shape=jax.ShapeDtypeStruct((1, n), jnp.float32),
        grid=grid,
        in_specs=[
            pl.BlockSpec((3, tile_n), lambda i: (0, i)),          # x tile (pipelined)
            pl.BlockSpec((m, 3), lambda i: (0, 0)),               # w1 (VMEM-resident)
            pl.BlockSpec((m, 1), lambda i: (0, 0)),               # b1
            pl.BlockSpec((m, m), lambda i: (0, 0)),               # w2
            pl.BlockSpec((m, 1), lambda i: (0, 0)),               # b2
            pl.BlockSpec((1, m), lambda i: (0, 0)),               # w3
            pl.BlockSpec((1, 1), lambda i: (0, 0),
                         memory_space=pltpu.MemorySpace.SMEM),    # b3 scalar
        ],
        out_specs=pl.BlockSpec((1, tile_n), lambda i: (0, i)),
        compiler_params=pltpu.CompilerParams(
            dimension_semantics=("parallel",),     # shard batch across TCs on v7x
            vmem_limit_bytes=vmem_limit,
        ),
        cost_estimate=cost,
    )(xT, params["w1"], params["b1"], w2, params["b2"],
      params["w3"], params["b3"])

    return out[0, :].reshape(n, 1)


def init_params(key, middledim):
    """PyTorch nn.Linear-style init (uniform(+/- 1/sqrt(fan_in)))."""
    ks = jax.random.split(key, 6)

    def linear(kw, kb, fan_in, fan_out):
        bound = 1.0 / (fan_in ** 0.5)
        w = jax.random.uniform(kw, (fan_out, fan_in), jnp.float32, -bound, bound)
        b = jax.random.uniform(kb, (fan_out, 1), jnp.float32, -bound, bound)
        return w, b

    w1, b1 = linear(ks[0], ks[1], 3, middledim)           # (M,3), (M,1)
    w2, b2 = linear(ks[2], ks[3], middledim, middledim)   # (M,M), (M,1)
    w3, b3 = linear(ks[4], ks[5], middledim, 1)           # (1,M), (1,1)
    return dict(w1=w1, b1=b1, w2=w2, b2=b2, w3=w3, b3=b3)


def reference_forward(x, p):
    h1 = jax.nn.sigmoid(x @ p["w1"].T + p["b1"].T)
    h2 = jax.nn.sigmoid(h1 @ p["w2"].T + p["b2"].T)
    return jax.nn.sigmoid(h2 @ p["w3"].T + p["b3"])


if __name__ == "__main__":
    key = jax.random.PRNGKey(0)
    k_x, k_p = jax.random.split(key)

    middledim = 32
    batch = 8
    x = jax.random.normal(k_x, (batch, 3), jnp.float32)
    params = init_params(k_p, middledim)

    y = jax.block_until_ready(mymodel_forward(x, params))
    y_ref = reference_forward(x, params)

    assert y.shape == (batch, 1)
    assert jnp.allclose(y, y_ref, atol=2e-5, rtol=2e-5), \
        float(jnp.max(jnp.abs(y - y_ref)))

    print("KERNEL_OK")
</pallas_src>

<mosaic_0001>
module attributes {stable_mosaic.version = 11 : i64} {
  func.func @_mlp_kernel(%arg0: i32, %arg1: memref<3x8xf32, #tpu.memory_space<vmem>>, %arg2: memref<32x3xf32, #tpu.memory_space<vmem>>, %arg3: memref<32x1xf32, #tpu.memory_space<vmem>>, %arg4: memref<32x32xf32, #tpu.memory_space<vmem>>, %arg5: memref<32x1xf32, #tpu.memory_space<vmem>>, %arg6: memref<1x32xf32, #tpu.memory_space<vmem>>, %arg7: memref<1x1xf32, #tpu.memory_space<smem>>, %arg8: memref<1x8xf32, #tpu.memory_space<vmem>>) attributes {dimension_semantics = [#tpu.dimension_semantics<parallel>], iteration_bounds = array<i64: 1>, scalar_prefetch = 0 : i64, scratch_operands = 0 : i64, tpu.core_type = #tpu.core_type<tc>, window_params = [{transform_indices = @transform_0, window_bounds = array<i64: 3, 8>}, {pipeline_mode = #tpu.pipeline_mode<synchronous>, transform_indices = @transform_1, window_bounds = array<i64: 32, 3>}, {pipeline_mode = #tpu.pipeline_mode<synchronous>, transform_indices = @transform_2, window_bounds = array<i64: 32, 1>}, {pipeline_mode = #tpu.pipeline_mode<synchronous>, transform_indices = @transform_3, window_bounds = array<i64: 32, 32>}, {pipeline_mode = #tpu.pipeline_mode<synchronous>, transform_indices = @transform_4, window_bounds = array<i64: 32, 1>}, {pipeline_mode = #tpu.pipeline_mode<synchronous>, transform_indices = @transform_5, window_bounds = array<i64: 1, 32>}, {transform_indices = @transform_6, window_bounds = array<i64: 1, 1>}, {transform_indices = @transform_7, window_bounds = array<i64: 1, 8>}]} {
    %c0 = arith.constant 0 : index
    %c0_0 = arith.constant 0 : index
    %0 = vector.load %arg2[%c0, %c0_0] : memref<32x3xf32, #tpu.memory_space<vmem>>, vector<32x3xf32>
    %c0_1 = arith.constant 0 : index
    %c0_2 = arith.constant 0 : index
    %1 = vector.load %arg1[%c0_1, %c0_2] : memref<3x8xf32, #tpu.memory_space<vmem>>, vector<3x8xf32>
    %cst = arith.constant dense<0.000000e+00> : vector<32x8xf32>
    %2 = tpu.matmul %0, %1, %cst {dimension_numbers = #tpu.dot_dimension_numbers<[1], [0], [0], [1], [0, 0, 1, 1], [], []>} : vector<32x3xf32>, vector<3x8xf32>, vector<32x8xf32> -> vector<32x8xf32>
    %c0_3 = arith.constant 0 : index
    %c0_4 = arith.constant 0 : index
    %3 = vector.load %arg3[%c0_3, %c0_4] : memref<32x1xf32, #tpu.memory_space<vmem>>, vector<32x1xf32>
    %4 = vector.broadcast %3 : vector<32x1xf32> to vector<32x8xf32>
    %5 = arith.addf %2, %4 : vector<32x8xf32>
    %cst_5 = arith.constant 5.000000e-01 : f32
    %6 = vector.broadcast %cst_5 : f32 to vector<32x8xf32>
    %7 = arith.mulf %6, %5 : vector<32x8xf32>
    %8 = math.tanh %7 : vector<32x8xf32>
    %cst_6 = arith.constant 5.000000e-01 : f32
    %9 = vector.broadcast %cst_6 : f32 to vector<32x8xf32>
    %10 = arith.mulf %9, %8 : vector<32x8xf32>
    %cst_7 = arith.constant 5.000000e-01 : f32
    %11 = vector.broadcast %cst_7 : f32 to vector<32x8xf32>
    %12 = arith.addf %10, %11 : vector<32x8xf32>
    %c0_8 = arith.constant 0 : index
    %c0_9 = arith.constant 0 : index
    %13 = vector.load %arg4[%c0_8, %c0_9] : memref<32x32xf32, #tpu.memory_space<vmem>>, vector<32x32xf32>
    %cst_10 = arith.constant dense<0.000000e+00> : vector<32x8xf32>
    %14 = tpu.matmul %13, %12, %cst_10 {dimension_numbers = #tpu.dot_dimension_numbers<[1], [0], [0], [1], [0, 0, 1, 1], [], []>} : vector<32x32xf32>, vector<32x8xf32>, vector<32x8xf32> -> vector<32x8xf32>
    %c0_11 = arith.constant 0 : index
    %c0_12 = arith.constant 0 : index
    %15 = vector.load %arg5[%c0_11, %c0_12] : memref<32x1xf32, #tpu.memory_space<vmem>>, vector<32x1xf32>
    %16 = vector.broadcast %15 : vector<32x1xf32> to vector<32x8xf32>
    %17 = arith.addf %14, %16 : vector<32x8xf32>
    %cst_13 = arith.constant 5.000000e-01 : f32
    %18 = vector.broadcast %cst_13 : f32 to vector<32x8xf32>
    %19 = arith.mulf %18, %17 : vector<32x8xf32>
    %20 = math.tanh %19 : vector<32x8xf32>
    %cst_14 = arith.constant 5.000000e-01 : f32
    %21 = vector.broadcast %cst_14 : f32 to vector<32x8xf32>
    %22 = arith.mulf %21, %20 : vector<32x8xf32>
    %cst_15 = arith.constant 5.000000e-01 : f32
    %23 = vector.broadcast %cst_15 : f32 to vector<32x8xf32>
    %24 = arith.addf %22, %23 : vector<32x8xf32>
    %c0_16 = arith.constant 0 : index
    %c0_17 = arith.constant 0 : index
    %25 = vector.load %arg6[%c0_16, %c0_17] : memref<1x32xf32, #tpu.memory_space<vmem>>, vector<1x32xf32>
    %cst_18 = arith.constant dense<0.000000e+00> : vector<1x8xf32>
    %26 = tpu.matmul %25, %24, %cst_18 {dimension_numbers = #tpu.dot_dimension_numbers<[1], [0], [0], [1], [0, 0, 1, 1], [], []>} : vector<1x32xf32>, vector<32x8xf32>, vector<1x8xf32> -> vector<1x8xf32>
    %c0_19 = arith.constant 0 : index
    %c0_20 = arith.constant 0 : index
    %27 = memref.load %arg7[%c0_19, %c0_20] : memref<1x1xf32, #tpu.memory_space<smem>>
    %28 = vector.broadcast %27 : f32 to vector<1x8xf32>
    %29 = arith.addf %26, %28 : vector<1x8xf32>
    %cst_21 = arith.constant 5.000000e-01 : f32
    %30 = vector.broadcast %cst_21 : f32 to vector<1x8xf32>
    %31 = arith.mulf %30, %29 : vector<1x8xf32>
    %32 = math.tanh %31 : vector<1x8xf32>
    %cst_22 = arith.constant 5.000000e-01 : f32
    %33 = vector.broadcast %cst_22 : f32 to vector<1x8xf32>
    %34 = arith.mulf %33, %32 : vector<1x8xf32>
    %cst_23 = arith.constant 5.000000e-01 : f32
    %35 = vector.broadcast %cst_23 : f32 to vector<1x8xf32>
    %36 = arith.addf %34, %35 : vector<1x8xf32>
    %c0_24 = arith.constant 0 : index
    %c0_25 = arith.constant 0 : index
    %37 = vector.load %arg8[%c0_24, %c0_25] : memref<1x8xf32, #tpu.memory_space<vmem>>, vector<1x8xf32>
    tpu.vector_store %arg8[%c0_24, %c0_25], %36 {strides = array<i32>} : memref<1x8xf32, #tpu.memory_space<vmem>>, vector<1x8xf32>,
    return
  }
  func.func @transform_0(%arg0: i32) -> (i32, i32) {
    %c0_i32 = arith.constant 0 : i32
    %c0_i32_0 = arith.constant 0 : i32
    return %c0_i32, %arg0 : i32, i32
  }
  func.func @transform_1(%arg0: i32) -> (i32, i32) {
    %c0_i32 = arith.constant 0 : i32
    %c0_i32_0 = arith.constant 0 : i32
    %c0_i32_1 = arith.constant 0 : i32
    return %c0_i32, %c0_i32_0 : i32, i32
  }
  func.func @transform_2(%arg0: i32) -> (i32, i32) {
    %c0_i32 = arith.constant 0 : i32
    %c0_i32_0 = arith.constant 0 : i32
    %c0_i32_1 = arith.constant 0 : i32
    return %c0_i32, %c0_i32_0 : i32, i32
  }
  func.func @transform_3(%arg0: i32) -> (i32, i32) {
    %c0_i32 = arith.constant 0 : i32
    %c0_i32_0 = arith.constant 0 : i32
    %c0_i32_1 = arith.constant 0 : i32
    return %c0_i32, %c0_i32_0 : i32, i32
  }
  func.func @transform_4(%arg0: i32) -> (i32, i32) {
    %c0_i32 = arith.constant 0 : i32
    %c0_i32_0 = arith.constant 0 : i32
    %c0_i32_1 = arith.constant 0 : i32
    return %c0_i32, %c0_i32_0 : i32, i32
  }
  func.func @transform_5(%arg0: i32) -> (i32, i32) {
    %c0_i32 = arith.constant 0 : i32
    %c0_i32_0 = arith.constant 0 : i32
    %c0_i32_1 = arith.constant 0 : i32
    return %c0_i32, %c0_i32_0 : i32, i32
  }
  func.func @transform_6(%arg0: i32) -> (i32, i32) {
    %c0_i32 = arith.constant 0 : i32
    %c0_i32_0 = arith.constant 0 : i32
    %c0_i32_1 = arith.constant 0 : i32
    return %c0_i32, %c0_i32_0 : i32, i32
  }
  func.func @transform_7(%arg0: i32) -> (i32, i32) {
    %c0_i32 = arith.constant 0 : i32
    %c0_i32_0 = arith.constant 0 : i32
    return %c0_i32, %arg0 : i32, i32
  }
}

</mosaic_0001>

<bundles_post_ra>
// kernel: tpu_custom_call.1
= control target key start
LH: loop header
LB: loop body
LE: loop exit
PB: predicated region body
PF: predicated region fallthrough
CT: control target
= control target key end

     0   :  { %vm70_vm0 = vcmask 1042432   ;;  %vm57_vm1 = vcmask 23552   ;;  %v537_v5 = vmov 0   ;;  %s660_s0 = inlined_call_operand.vmem [shape: f32[3,8], index: 0, kind: input, shape index: {}]   ;;  %s661_s1 = inlined_call_operand.vmem [shape: f32[32,3], index: 1, kind: input, shape index: {}]   ;;  %s662_s2 = inlined_call_operand.vmem [shape: f32[32,1], index: 2, kind: input, shape index: {}]   ;;  %s663_s3 = inlined_call_operand.vmem [shape: f32[32,32], index: 3, kind: input, shape index: {}]   ;;  %s664_s4 = inlined_call_operand.vmem [shape: f32[32,1], index: 4, kind: input, shape index: {}]   ;;  %s665_s5 = inlined_call_operand.vmem [shape: f32[1,32], index: 5, kind: input, shape index: {}]   ;;  %s666_s6 = inlined_call_operand.<no memory space> [shape: f32[1,1], index: 6, kind: input, shape index: {}]   ;;  %s667_s7 = inlined_call_operand.hbm [shape: f32[1,8], index: 7, kind: output, shape index: {}]  }
   0x1   :  { %v32_v0 = vld [vmem:[%s660_s0] sm:$0x7]  ;;  %v29_v2 = vld [vmem:[%s661_s1 + $0x8] sm:$0xff]  ;;  %v30_v3 = vld [vmem:[%s661_s1 + $0x10] sm:$0xff]  ;;  %493 = vset.pattern.permute.xlu0 %v537_v5  ;;  %494 = vset.pattern.permute.xlu1 %v537_v5 }
   0x2   :  { %v28_v1 = vld [vmem:[%s661_s1] sm:$0xff]  ;;  %441 = vmatprep.subr.msk.mxu0 %vm70_vm0, %v32_v0  ;;  %v35_v6 = vld [vmem:[%s662_s2 + $0x10] sm:$0xff]  ;;  %v31_v7 = vld [vmem:[%s661_s1 + $0x18] sm:$0xff] }
   0x3   :  { %443 = vmatprep.mubr.msk.f32.mxu0 %vm57_vm1, %v28_v1  ;;  %v33_v4 = vld [vmem:[%s662_s2] sm:$0xff]  ;;  %442 = vmatpush3.msk.msra.mxu0 %vm70_vm0, %v32_v0  ;;  %v34_v8 = vld [vmem:[%s662_s2 + $0x8] sm:$0xff] }
   0x4   :  { %444 = vmatmul.mubr.msk.f32.vlgmr.msra.gmra.mrb[0].mxu0 %vm57_vm1, %v29_v2  ;;  %39 = vperm.xlu0 %493, %v33_v4  }
   0x5   :  { %446 = vmatprep.mubr.msk.f32.mxu0 %vm57_vm1, %v30_v3 }
   0x6   :  { %13 = vsyncpa [#allocation4], 0  ;;  %49 = vperm.xlu1 %494, %v35_v6   ;;  %v36_v9 = vld [vmem:[%s662_s2 + $0x18] sm:$0xff]  ;;  %v179_v10 = vld [vmem:[%s664_s4] sm:$0xff]  ;;  %vm203_vm2 = vcmask 261120   ;;  %v538_v48 = vmov 0.0|0.0  }
   0x7   :  { %v180_v11 = vld [vmem:[%s664_s4 + $0x8] sm:$0xff]  ;;  %v181_v12 = vld [vmem:[%s664_s4 + $0x10] sm:$0xff]  ;;  %v182_v13 = vld [vmem:[%s664_s4 + $0x18] sm:$0xff]  ;;  %482 = vmatprep.subr.bf16.mxu0 %v538_v48  ;;  %vm539_vm3 = vmmov 0   ;;  %v540_v49 = vmov 0.0   ;;  %s541_s0 = smov [#allocation3]  }
   0x8   :  { %447 = vmatmul.mubr.msk.f32.gmra.mrb[2].mxu0 %vm57_vm1, %v31_v7  ;;  %44 = vperm.xlu0 %493, %v34_v8   ;;  %v175_v14 = vld [vmem:[%s663_s3] sm:$0xff]  ;;  %v176_v45 = vld [vmem:[%s663_s3 + $0x8] sm:$0xff]  ;;  %v177_v46 = vld [vmem:[%s663_s3 + $0x10] sm:$0xff]  ;;  %s405_s11 = sshll.u32 %s541_s0, 4  ;;  %vm397_vm4 = vcmask 57344   ;;  %s406_s11 = int_to_ptr.vmem [resolvable:$true] %s405_s11 }
   0x9   :  { %457 = vmatprep.mubr.msk.f32.mxu1 %vm203_vm2, %v175_v14  ;;  %v178_v47 = vld [vmem:[%s663_s3 + $0x18] sm:$0xff]  ;;  %471 = vmatprep.mubr.msk.f32.mxu0 %vm539_vm3, %v540_v49  ;;  %s517_s12 = scalar_lea.vmem %s406_s11, 32  ;;  %p518_p1 = scmp.lt.s32.totalorder %s406_s11, %s406_s11 }
   0xa   :  { %54 = vperm.xlu1 %494, %v36_v9  }
   0xc   :  { %185 = vperm.xlu0 %493, %v179_v10  }
   0xe   :  { %190 = vperm.xlu1 %494, %v180_v11  }
  0x10   :  { %195 = vperm.xlu0 %493, %v181_v12  }
  0x12   :  { %200 = vperm.xlu1 %494, %v182_v13  }
  0x83   :  { %v40_v15 = vpop.permute.xlu0 %39 }
  0x85   :  { %v50_v16 = vpop.permute.xlu1 %49 }
  0x87   :  { %v45_v17 = vpop.permute.xlu0 %44 }
  0x89   :  { %v55_v23 = vpop.permute.xlu1 %54 }
  0x8b   :  { %v186_v51 = vpop.permute.xlu0 %185 }
  0x8d   :  { %v191_v50 = vpop.permute.xlu1 %190 }
  0x8f   :  { %v196_v60 = vpop.permute.xlu0 %195 }
  0x91   :  { %v201_v57 = vpop.permute.xlu1 %200 }
  0xd7   :  { %v445_v18 = vpop.f32.mrb[0].mxu0 }
  0xd8   :  { %v146_v19 = vadd.f32 %v445_v18, %v45_v17  ;;  %v140_v20 = vpop.f32.mrb[1].mxu0  ;;  %v319_v17 = vstv %s666_s6 }
  0xd9   :  { %v141_v21 = vadd.f32 %v140_v20, %v40_v15 }
  0xda   :  { %v160_v22 = vmul.f32 0.5, %v146_v19 }
  0xdb   :  { %v159_v24 = vmul.f32 0.5, %v141_v21  ;;  %v448_v25 = vpop.f32.mrb[2].mxu0 }
  0xdc   :  { %495 = vtanh.f32 %v160_v22  ;;  %v156_v26 = vadd.f32 %v448_v25, %v55_v23  ;;  %v150_v27 = vpop.f32.mrb[3].mxu0 }
  0xdd   :  { %497 = vtanh.f32 %v159_v24  ;;  %v151_v28 = vadd.f32 %v150_v27, %v50_v16  ;;  %v317_v16 = vld [vmem:[%s665_s5] sm:$0x1]  ;;  %s513_s5 = scalar_lea.vmem %s406_s11, 16 }
  0xde   :  { %v162_v29 = vmul.f32 0.5, %v156_v26  ;;  %p514_p0 = scmp.ne.s32.totalorder %s406_s11, %s513_s5  ;;  %p519_p2 = scmp.lt.s32.totalorder %s517_s12, %s513_s5 }
  0xdf   :  { %v161_v30 = vmul.f32 0.5, %v151_v28 }
  0xe0   :  { %499 = vtanh.f32 %v162_v29  ;;  %p520_p3 = por %p519_p2, %p518_p1 }
  0xe1   :  { %501 = vtanh.f32 %v161_v30 }
  0xe2   :  { %p521_p4 = pnand %p520_p3, %p514_p0 }
  0xe6   :  { %v496_v31 = vpop.eup %495 }
  0xe7   :  { %v498_v32 = vpop.eup %497  ;;  %v168_v33 = vmul.f32 0.5, %v496_v31 }
  0xe8   :  { %v167_v34 = vmul.f32 0.5, %v498_v32 }
  0xe9   :  { %v172_v35 = vadd.f32 0.5, %v168_v33 }
  0xea   :  { %v500_v36 = vpop.eup %499  ;;  %v171_v37 = vadd.f32 0.5, %v167_v34 }
  0xeb   :  { %v502_v38 = vpop.eup %501  ;;  %v170_v39 = vmul.f32 0.5, %v500_v36 }
  0xec   :  { %v169_v40 = vmul.f32 0.5, %v502_v38  ;;  %v474_v41 = vpack.c.bf16 %v172_v35, %v171_v37 }
  0xed   :  { %v174_v42 = vadd.f32 0.5, %v170_v39 }
  0xee   :  { %v173_v43 = vadd.f32 0.5, %v169_v40  ;;  %475 = vmatprep.subr.bf16.mxu1 %v474_v41 }
  0xef   :  { %477 = vmatpush3.bf16.msra.mxu1 %v474_v41 }
  0xf0   :  { %v478_v44 = vpack.c.bf16 %v174_v42, %v173_v43 }
  0xf2   :  { %479 = vmatprep.subr.bf16.mxu1 %v478_v44 }
  0xf3   :  { %481 = vmatpush3.bf16.msra.mxu1 %v478_v44 }
  0xf6   :  { %458 = vmatmul.mubr.msk.f32.vlgmr.msra.gmra.mrb[0].mxu1 %vm203_vm2, %v176_v45 }
  0xf7   :  { %460 = vmatprep.mubr.msk.f32.mxu1 %vm203_vm2, %v177_v46 }
  0xfa   :  { %461 = vmatmul.mubr.msk.f32.gmra.mrb[2].mxu1 %vm203_vm2, %v178_v47 }
 0x1c9   :  { %v459_v52 = vpop.f32.mrb[0].mxu1 }
 0x1ca   :  { %v288_v53 = vadd.f32 %v459_v52, %v191_v50  ;;  %v282_v54 = vpop.f32.mrb[1].mxu1 }
 0x1cb   :  { %v283_v55 = vadd.f32 %v282_v54, %v186_v51 }
 0x1cc   :  { %v302_v56 = vmul.f32 0.5, %v288_v53 }
 0x1cd   :  { %v301_v58 = vmul.f32 0.5, %v283_v55  ;;  %v462_v59 = vpop.f32.mrb[2].mxu1 }
 0x1ce   :  { %503 = vtanh.f32 %v302_v56  ;;  %v298_v61 = vadd.f32 %v462_v59, %v201_v57  ;;  %v292_v62 = vpop.f32.mrb[3].mxu1 }
 0x1cf   :  { %505 = vtanh.f32 %v301_v58  ;;  %v293_v63 = vadd.f32 %v292_v62, %v196_v60 }
 0x1d0   :  { %v304_v0 = vmul.f32 0.5, %v298_v61 }
 0x1d1   :  { %v303_v1 = vmul.f32 0.5, %v293_v63 }
 0x1d2   :  { %507 = vtanh.f32 %v304_v0 }
 0x1d3   :  { %509 = vtanh.f32 %v303_v1 }
 0x1d8   :  { %v504_v2 = vpop.eup %503 }
 0x1d9   :  { %v506_v3 = vpop.eup %505  ;;  %v310_v4 = vmul.f32 0.5, %v504_v2 }
 0x1da   :  { %v309_v5 = vmul.f32 0.5, %v506_v3 }
 0x1db   :  { %v314_v6 = vadd.f32 0.5, %v310_v4 }
 0x1dc   :  { %v508_v7 = vpop.eup %507  ;;  %v313_v8 = vadd.f32 0.5, %v309_v5 }
 0x1dd   :  { %v510_v9 = vpop.eup %509  ;;  %v312_v10 = vmul.f32 0.5, %v508_v7 }
 0x1de   :  { %v483_v11 = vpack.c.bf16 %v314_v6, %v313_v8  ;;  %v311_v12 = vmul.f32 0.5, %v510_v9 }
 0x1df   :  { %v316_v13 = vadd.f32 0.5, %v312_v10 }
 0x1e0   :  { %v315_v14 = vadd.f32 0.5, %v311_v12  ;;  %484 = vmatpush3.bf16.msra.mxu0 %v483_v11 }
 0x1e1   :  { %485 = vmatprep.subr.bf16.mxu0 %v538_v48 }
 0x1e2   :  { %v486_v15 = vpack.c.bf16 %v316_v13, %v315_v14 }
 0x1e4   :  { %487 = vmatpush3.bf16.msra.mxu0 %v486_v15 }
 0x1e7   :  { %472 = vmatmul.mubr.msk.f32.vlgmr.msra.gmra.mrb[4].mxu0 %vm203_vm2, %v317_v16 }
 0x2ba   :  { %v389_v18 = vpop.f32.mrb[4].mxu0 }
 0x2bb   :  { %v390_v19 = vadd.f32 %v389_v18, %v319_v17  ;;  %v473_v20 = vpop.f32.mrb[5].mxu0 }
 0x2bd   :  { %v393_v21 = vmul.f32 0.5, %v390_v19 }
 0x2bf   :  { %511 = vtanh.f32 %v393_v21 }
 0x2c9   :  { %v512_v22 = vpop.eup %511 }
 0x2ca   :  { %v395_v23 = vmul.f32 0.5, %v512_v22 }
 0x2cc   :  { %v396_v24 = vadd.f32 0.5, %v395_v23 }
 0x2ce   :  { %398 = vst.msk [vmem:[#allocation3] sm:$0x1] %vm397_vm4, %v396_v24 }
 0x2cf   :  { %524 = shalt.err (!%p521_p4)
}
 0x2d0   :  { %s525_s14 = scalar_lea.hbm %s667_s7, 16 }
 0x2d1   :  { %p526_p5 = scmp.ne.s32.totalorder %s667_s7, %s525_s14  ;;  %p529_p6 = scmp.lt.u32.totalorder %s525_s14, %s667_s7 }
 0x2d3   :  { %p531_p7 = pnand %p529_p6, %p526_p5 }
 0x2d5   :  { %534 = shalt.err (!%p531_p7)
}
 0x2d6   :  { %408 = dma.vmem_to_hbm [thread:$0]  %s406_s11, 16, %s667_s7, [#allocation4]  }
 0x2d7   :  { %535 = dma.done.wait [#allocation4], 16  }
 0x2d8   :  { %536 = vsyncadd [#allocation4], 4294967280 }
 0x2d9   :  { %412 = vsyncpa [#allocation4], 1 }

</bundles_post_ra>
